<compile_context>
chip_gen: v7x
topology: tpu7x:2x2x1
jax: 0.10.0
libtpu: 0.0.40
codegen_flags: <defaults>
</compile_context>

<pallas_src>
import functools

import jax
import jax.numpy as jnp
from jax.experimental import pallas as pl
from jax.experimental.pallas import tpu as pltpu

BN_EPS = 1e-5
LEAKY_SLOPE = 0.01

# Per-input-tile budget (bytes).  Pallas double-buffers, so ~2x this is
# resident in VMEM -- conservative for v7x (64 MiB physical / 32 MiB scoped),
# still large enough to sit at the HBM roofline on v5e/v6e.
_DEFAULT_TILE_BYTES = 4 * 1024 * 1024
_VMEM_LIMIT_BYTES = 32 * 1024 * 1024


def _pick_hw_tile(hw, c, max_tile_bytes):
    """Largest lane tile (multiple of 128) whose (C, t) f32 block fits budget."""
    t = max(128, (max_tile_bytes // (c * 4)) // 128 * 128)
    if t >= hw:
        return hw          # single full-extent block along HW (valid even if < 128)
    return t               # multiple of 128; last block may be partial (masked)


def aig_gate_kernel(x_ref, w1_ref, b1_ref, w2_ref, b2_ref, o_ref, acc_ref,
                    *, hw, t_hw):
    # grid = (N, num_hw_tiles); axis 1 is the HW reduction axis.
    k = pl.program_id(1)

    @pl.when(k == 0)
    def _():
        acc_ref[...] = jnp.zeros_like(acc_ref)

    x = x_ref[...].astype(jnp.float32)                 # (1, C, t_hw)
    if hw % t_hw != 0:
        # Last block is padded by Pallas with unspecified values -> mask them.
        lane = jax.lax.broadcasted_iota(jnp.int32, x.shape, 2)
        x = jnp.where(k * t_hw + lane < hw, x, 0.0)

    acc_ref[...] += jnp.sum(x, axis=2)                 # (1, C) partial sums

    @pl.when(k == pl.num_programs(1) - 1)
    def _():
        pooled = acc_ref[...] * (1.0 / hw)             # single scale at finalize
        # conv1 (1x1, BN folded in) == linear: (1, C) @ (C, C4) + b1'
        h = jnp.dot(pooled, w1_ref[...],
                    preferred_element_type=jnp.float32) + b1_ref[...]
        # leaky_relu, default negative_slope = 0.01
        h = jnp.where(h >= 0, h, LEAKY_SLOPE * h)
        # conv2 (1x1) == linear: (1, C4) @ (C4, 2) + b2  (tiny; FLOPs negligible)
        y = jnp.dot(h, w2_ref[...],
                    preferred_element_type=jnp.float32) + b2_ref[...]
        o_ref[...] = y.reshape(o_ref.shape).astype(o_ref.dtype)


def aig_gate(x_nchw, params, *, max_tile_bytes=_DEFAULT_TILE_BYTES):
    """x_nchw: (N, C, H, W) float32.  Returns (N, 2, 1, 1) float32."""
    N, C, H, W = x_nchw.shape
    HW = H * W
    c4 = params["w1"].shape[1]

    # Free reshape (no transpose / no extra HBM traffic): channels on sublanes,
    # spatial on lanes.
    x = x_nchw.reshape(N, C, HW)

    # Fold eval-mode BatchNorm into conv1 (exact for inference).
    scale = params["gamma"] * jax.lax.rsqrt(params["rv"] + BN_EPS)   # (1, C4)
    w1f = params["w1"] * scale                                        # (C, C4)
    b1f = (params["b1"] - params["rm"]) * scale + params["beta"]      # (1, C4)
    w2, b2 = params["w2"], params["b2"]

    t_hw = _pick_hw_tile(HW, C, max_tile_bytes)
    n_hw = pl.cdiv(HW, t_hw)

    kernel = functools.partial(aig_gate_kernel, hw=HW, t_hw=t_hw)

    grid_spec = pltpu.PrefetchScalarGridSpec(
        num_scalar_prefetch=0,
        grid=(N, n_hw),
        in_specs=[
            # x: tiled over (batch, HW); C stays full (sublane dim).
            pl.BlockSpec((1, C, t_hw), lambda n, k: (n, 0, k)),
            # small params: full blocks, resident across the whole grid.
            pl.BlockSpec((C, c4), lambda n, k: (0, 0)),
            pl.BlockSpec((1, c4), lambda n, k: (0, 0)),
            pl.BlockSpec((c4, 2), lambda n, k: (0, 0)),
            pl.BlockSpec((1, 2), lambda n, k: (0, 0)),
        ],
        # Output kept as (N, 1, 2) so the last two block dims equal the full
        # array dims; reshaped to (N, 2, 1, 1) by the wrapper.
        out_specs=pl.BlockSpec((1, 1, 2), lambda n, k: (n, 0, 0)),
        scratch_shapes=[pltpu.VMEM((1, C), jnp.float32)],
    )

    param_bytes = 4 * (w1f.size + b1f.size + w2.size + b2.size)
    cost = pl.CostEstimate(
        flops=N * C * HW + 2 * N * (C * c4 + c4 * 2),
        transcendentals=0,
        bytes_accessed=N * C * HW * 4 + param_bytes + N * 2 * 4,
    )

    out = pl.pallas_call(
        kernel,
        out_shape=jax.ShapeDtypeStruct((N, 1, 2), jnp.float32),
        grid_spec=grid_spec,
        compiler_params=pltpu.CompilerParams(
            dimension_semantics=("parallel", "arbitrary"),
            vmem_limit_bytes=_VMEM_LIMIT_BYTES,
        ),
        cost_estimate=cost,
    )(x, w1f, b1f, w2, b2)

    return out.reshape(N, 2, 1, 1)


def init_params(key, in_channel):
    c4 = in_channel // 4
    k1, k2, k3, k4, k5, k6 = jax.random.split(key, 6)
    return {
        # conv1: Conv2d(C, C/4, 1) -> weight (C/4, C, 1, 1); stored as (C, C/4)
        "w1": jax.random.normal(k1, (in_channel, c4), jnp.float32) * 0.1,
        "b1": jax.random.normal(k2, (1, c4), jnp.float32) * 0.1,
        # BatchNorm2d(C/4) params + running stats (deterministic, non-trivial)
        "gamma": 1.0 + 0.1 * jax.random.normal(k3, (1, c4), jnp.float32),
        "beta": 0.1 * jax.random.normal(k4, (1, c4), jnp.float32),
        "rm": 0.05 * jnp.arange(c4, dtype=jnp.float32).reshape(1, c4),
        "rv": 1.0 + 0.02 * jnp.arange(c4, dtype=jnp.float32).reshape(1, c4),
        # conv2: Conv2d(C/4, 2, 1) -> weight (2, C/4, 1, 1); stored as (C/4, 2)
        "w2": jax.random.normal(k5, (c4, 2), jnp.float32) * 0.1,
        "b2": jax.random.normal(k6, (1, 2), jnp.float32) * 0.1,
    }


def reference(x_nchw, p):
    """Pure-JAX reference of the same forward pass (unfolded BN)."""
    pooled = jnp.mean(x_nchw, axis=(2, 3))                       # (N, C)
    h = pooled @ p["w1"] + p["b1"]                               # (N, C4)
    h = (h - p["rm"]) / jnp.sqrt(p["rv"] + BN_EPS) * p["gamma"] + p["beta"]
    h = jnp.where(h >= 0, h, LEAKY_SLOPE * h)
    y = h @ p["w2"] + p["b2"]                                    # (N, 2)
    return y.reshape(y.shape[0], 2, 1, 1)


if __name__ == "__main__":
    key = jax.random.PRNGKey(0)
    kx1, kx2, kp1, kp2 = jax.random.split(key, 4)

    # Case 1: small shape (single HW tile), in_channel=16 -> hidden 4 -> out 2.
    N, C, H, W = 2, 16, 8, 8
    x = jax.random.normal(kx1, (N, C, H, W), jnp.float32)
    params = init_params(kp1, C)
    out = jax.block_until_ready(aig_gate(x, params))
    ref = reference(x, params)
    assert out.shape == (N, 2, 1, 1)
    assert jnp.allclose(out, ref, atol=1e-5, rtol=1e-5), (out, ref)

    # Case 2: force multiple HW tiles + a masked partial last tile
    # (HW = 20*20 = 400, forced tile = 128 -> 4 tiles, last one partially valid).
    N2, C2, H2, W2 = 2, 8, 20, 20
    x2 = jax.random.normal(kx2, (N2, C2, H2, W2), jnp.float32)
    params2 = init_params(kp2, C2)
    out2 = jax.block_until_ready(
        aig_gate(x2, params2, max_tile_bytes=128 * C2 * 4))
    ref2 = reference(x2, params2)
    assert jnp.allclose(out2, ref2, atol=1e-5, rtol=1e-5), (out2, ref2)

    print("KERNEL_OK")
</pallas_src>

<mosaic_0001>
module attributes {stable_mosaic.version = 11 : i64} {
  func.func @aig_gate_kernel(%arg0: i32, %arg1: i32, %arg2: memref<1x16x64xf32, #tpu.memory_space<vmem>>, %arg3: memref<16x4xf32, #tpu.memory_space<vmem>>, %arg4: memref<1x4xf32, #tpu.memory_space<vmem>>, %arg5: memref<4x2xf32, #tpu.memory_space<vmem>>, %arg6: memref<1x2xf32, #tpu.memory_space<vmem>>, %arg7: memref<1x1x2xf32, #tpu.memory_space<vmem>>, %arg8: memref<1x16xf32, #tpu.memory_space<vmem>>) attributes {dimension_semantics = [#tpu.dimension_semantics<parallel>, #tpu.dimension_semantics<arbitrary>], iteration_bounds = array<i64: 2, 1>, scalar_prefetch = 0 : i64, scratch_operands = 1 : i64, tpu.core_type = #tpu.core_type<tc>, window_params = [{transform_indices = @transform_0, window_bounds = array<i64: 1, 16, 64>}, {pipeline_mode = #tpu.pipeline_mode<synchronous>, transform_indices = @transform_1, window_bounds = array<i64: 16, 4>}, {pipeline_mode = #tpu.pipeline_mode<synchronous>, transform_indices = @transform_2, window_bounds = array<i64: 1, 4>}, {pipeline_mode = #tpu.pipeline_mode<synchronous>, transform_indices = @transform_3, window_bounds = array<i64: 4, 2>}, {pipeline_mode = #tpu.pipeline_mode<synchronous>, transform_indices = @transform_4, window_bounds = array<i64: 1, 2>}, {transform_indices = @transform_5, window_bounds = array<i64: 1, 1, 2>}]} {
    %c0_i32 = arith.constant 0 : i32
    %0 = arith.cmpi eq, %arg1, %c0_i32 : i32
    %1 = arith.extui %0 : i1 to i32
    %c0_i32_0 = arith.constant 0 : i32
    %2 = arith.cmpi ne, %1, %c0_i32_0 : i32
    scf.if %2 {
      %cst_9 = arith.constant 0.000000e+00 : f32
      %11 = vector.broadcast %cst_9 : f32 to vector<1x16xf32>
      %c0_10 = arith.constant 0 : index
      %c0_11 = arith.constant 0 : index
      %12 = vector.load %arg8[%c0_10, %c0_11] : memref<1x16xf32, #tpu.memory_space<vmem>>, vector<1x16xf32>
      tpu.vector_store %arg8[%c0_10, %c0_11], %11 {strides = array<i32>} : memref<1x16xf32, #tpu.memory_space<vmem>>, vector<1x16xf32>,
    } else {
    }
    %c0 = arith.constant 0 : index
    %c0_1 = arith.constant 0 : index
    %c0_2 = arith.constant 0 : index
    %3 = vector.load %arg2[%c0, %c0_1, %c0_2] : memref<1x16x64xf32, #tpu.memory_space<vmem>>, vector<1x16x64xf32>
    %c0_3 = arith.constant 0 : index
    %c0_4 = arith.constant 0 : index
    %4 = vector.load %arg8[%c0_3, %c0_4] : memref<1x16xf32, #tpu.memory_space<vmem>>, vector<1x16xf32>
    %cst = arith.constant dense<0.000000e+00> : vector<1x16xf32>
    %5 = vector.multi_reduction <add>, %3, %cst [2] : vector<1x16x64xf32> to vector<1x16xf32>
    %6 = arith.addf %4, %5 : vector<1x16xf32>
    %c0_5 = arith.constant 0 : index
    %c0_6 = arith.constant 0 : index
    %7 = vector.load %arg8[%c0_5, %c0_6] : memref<1x16xf32, #tpu.memory_space<vmem>>, vector<1x16xf32>
    tpu.vector_store %arg8[%c0_5, %c0_6], %6 {strides = array<i32>} : memref<1x16xf32, #tpu.memory_space<vmem>>, vector<1x16xf32>,
    %c0_i32_7 = arith.constant 0 : i32
    %8 = arith.cmpi eq, %arg1, %c0_i32_7 : i32
    %9 = arith.extui %8 : i1 to i32
    %c0_i32_8 = arith.constant 0 : i32
    %10 = arith.cmpi ne, %9, %c0_i32_8 : i32
    scf.if %10 {
      %c0_9 = arith.constant 0 : index
      %c0_10 = arith.constant 0 : index
      %11 = vector.load %arg8[%c0_9, %c0_10] : memref<1x16xf32, #tpu.memory_space<vmem>>, vector<1x16xf32>
      %cst_11 = arith.constant 1.562500e-02 : f32
      %12 = vector.broadcast %cst_11 : f32 to vector<1x16xf32>
      %13 = arith.mulf %11, %12 : vector<1x16xf32>
      %c0_12 = arith.constant 0 : index
      %c0_13 = arith.constant 0 : index
      %14 = vector.load %arg3[%c0_12, %c0_13] : memref<16x4xf32, #tpu.memory_space<vmem>>, vector<16x4xf32>
      %cst_14 = arith.constant dense<0.000000e+00> : vector<1x4xf32>
      %15 = tpu.matmul %13, %14, %cst_14 {dimension_numbers = #tpu.dot_dimension_numbers<[1], [0], [0], [1], [0, 0, 1, 1], [], []>} : vector<1x16xf32>, vector<16x4xf32>, vector<1x4xf32> -> vector<1x4xf32>
      %c0_15 = arith.constant 0 : index
      %c0_16 = arith.constant 0 : index
      %16 = vector.load %arg4[%c0_15, %c0_16] : memref<1x4xf32, #tpu.memory_space<vmem>>, vector<1x4xf32>
      %17 = arith.addf %15, %16 : vector<1x4xf32>
      %cst_17 = arith.constant 0.000000e+00 : f32
      %18 = vector.broadcast %cst_17 : f32 to vector<1x4xf32>
      %19 = arith.cmpf oge, %17, %18 : vector<1x4xf32>
      %cst_18 = arith.constant 0.00999999977 : f32
      %20 = vector.broadcast %cst_18 : f32 to vector<1x4xf32>
      %21 = arith.mulf %20, %17 : vector<1x4xf32>
      %22 = arith.select %19, %17, %21 : vector<1x4xi1>, vector<1x4xf32>
      %c0_19 = arith.constant 0 : index
      %c0_20 = arith.constant 0 : index
      %23 = vector.load %arg5[%c0_19, %c0_20] : memref<4x2xf32, #tpu.memory_space<vmem>>, vector<4x2xf32>
      %cst_21 = arith.constant dense<0.000000e+00> : vector<1x2xf32>
      %24 = tpu.matmul %22, %23, %cst_21 {dimension_numbers = #tpu.dot_dimension_numbers<[1], [0], [0], [1], [0, 0, 1, 1], [], []>} : vector<1x4xf32>, vector<4x2xf32>, vector<1x2xf32> -> vector<1x2xf32>
      %c0_22 = arith.constant 0 : index
      %c0_23 = arith.constant 0 : index
      %25 = vector.load %arg6[%c0_22, %c0_23] : memref<1x2xf32, #tpu.memory_space<vmem>>, vector<1x2xf32>
      %26 = arith.addf %24, %25 : vector<1x2xf32>
      %27 = vector.shape_cast %26 : vector<1x2xf32> to vector<1x1x2xf32>
      %c0_24 = arith.constant 0 : index
      %c0_25 = arith.constant 0 : index
      %c0_26 = arith.constant 0 : index
      %28 = vector.load %arg7[%c0_24, %c0_25, %c0_26] : memref<1x1x2xf32, #tpu.memory_space<vmem>>, vector<1x1x2xf32>
      tpu.vector_store %arg7[%c0_24, %c0_25, %c0_26], %27 {strides = array<i32>} : memref<1x1x2xf32, #tpu.memory_space<vmem>>, vector<1x1x2xf32>,
    } else {
    }
    return
  }
  func.func @transform_0(%arg0: i32, %arg1: i32) -> (i32, i32, i32) {
    %c0_i32 = arith.constant 0 : i32
    %c0_i32_0 = arith.constant 0 : i32
    return %arg0, %c0_i32, %arg1 : i32, i32, i32
  }
  func.func @transform_1(%arg0: i32, %arg1: i32) -> (i32, i32) {
    %c0_i32 = arith.constant 0 : i32
    %c0_i32_0 = arith.constant 0 : i32
    %c0_i32_1 = arith.constant 0 : i32
    return %c0_i32, %c0_i32_0 : i32, i32
  }
  func.func @transform_2(%arg0: i32, %arg1: i32) -> (i32, i32) {
    %c0_i32 = arith.constant 0 : i32
    %c0_i32_0 = arith.constant 0 : i32
    %c0_i32_1 = arith.constant 0 : i32
    return %c0_i32, %c0_i32_0 : i32, i32
  }
  func.func @transform_3(%arg0: i32, %arg1: i32) -> (i32, i32) {
    %c0_i32 = arith.constant 0 : i32
    %c0_i32_0 = arith.constant 0 : i32
    %c0_i32_1 = arith.constant 0 : i32
    return %c0_i32, %c0_i32_0 : i32, i32
  }
  func.func @transform_4(%arg0: i32, %arg1: i32) -> (i32, i32) {
    %c0_i32 = arith.constant 0 : i32
    %c0_i32_0 = arith.constant 0 : i32
    %c0_i32_1 = arith.constant 0 : i32
    return %c0_i32, %c0_i32_0 : i32, i32
  }
  func.func @transform_5(%arg0: i32, %arg1: i32) -> (i32, i32, i32) {
    %c0_i32 = arith.constant 0 : i32
    %c0_i32_0 = arith.constant 0 : i32
    %c0_i32_1 = arith.constant 0 : i32
    return %arg0, %c0_i32, %c0_i32_0 : i32, i32, i32
  }
}

</mosaic_0001>

<bundles_post_ra>
// kernel: tpu_custom_call.1
= control target key start
LH: loop header
LB: loop body
LE: loop exit
PB: predicated region body
PF: predicated region fallthrough
CT: control target
= control target key end

     0   :  { %10 = vsyncpa [#allocation4], 0  ;;  %s1212_s0 = inlined_call_operand.hbm [shape: f32[2,16,64], index: 0, kind: input, shape index: {}]   ;;  %s1213_s1 = inlined_call_operand.vmem [shape: f32[16,4], index: 1, kind: input, shape index: {}]   ;;  %s1214_s2 = inlined_call_operand.vmem [shape: f32[1,4], index: 2, kind: input, shape index: {}]   ;;  %s1215_s3 = inlined_call_operand.vmem [shape: f32[4,2], index: 3, kind: input, shape index: {}]   ;;  %s1216_s4 = inlined_call_operand.vmem [shape: f32[1,2], index: 4, kind: input, shape index: {}]   ;;  %s1217_s5 = inlined_call_operand.hbm [shape: f32[2,1,2], index: 5, kind: output, shape index: {}]  }
   0x1   :  { %12 = vsyncpa [#allocation4 + $0x1], 0 }
   0x2   :  { %13 = vsyncpa [#allocation5], 0 }
   0x3   :  { %15 = vsyncpa [#allocation5 + $0x1], 0  ;;  %s990_s18 = smov 0   ;;  %s992_s19 = smov 0  }
   0x4   :  { %s994_s20 = smov 0   ;;  %s996_s21 = smov 0  }
   0x5   :  { %s998_s22 = smov 0   ;;  %s1000_s23 = smov 0  }
   0x6 LB: > { %s730_s24 = sadd.s32 4294967295, %s949_s23   ;;  %s731_s25 = sadd.s32 4294967294, %s949_s23   ;;  %s949_s23 = sphi %s1000_s23, %s21_s23   ;;  %s945_s22 = sphi %s998_s22, %s1232_s22   ;;  %s941_s21 = sphi %s996_s21, %s1231_s21   ;;  %s937_s20 = sphi %s994_s20, %s1230_s20   ;;  %s933_s19 = sphi %s992_s19, %s1229_s19   ;;  %s929_s18 = sphi %s990_s18, %s1228_s18  }
   0x7   : > { %s33_s26 = sadd.s32 1, %s945_s22  ;;  %s42_s27 = sadd.s32 1, %s937_s20 }
   0x8   : > { %p35_p0 = scmp.ge.s32.totalorder %s33_s26, 2  ;;  %p49_p1 = scmp.ne.s32.totalorder %s937_s20, %s933_s19 }
   0x9   : > { %p50_p2 = scmp.eq.s32.totalorder %s949_s23, 0  ;;  %p55_p3 = scmp.ne.s32.totalorder %s933_s19, %s929_s18 }
   0xa   : > { %s1234_s26 = smov (%p35_p0, %s33_s26), 0  ;;  %p56_p5 = scmp.eq.s32.totalorder %s730_s24, 0 }
   0xb   : > { %p1031_p4 = por %p50_p2, %p49_p1  ;;  %s37_s29 = ssub.s32 %s945_s22, %s1234_s26 }
   0xc   : > { %p163_p6 = scmp.eq.s32.totalorder %s730_s24, 1  ;;  %p40_p7 = scmp.eq.s32.totalorder %s37_s29, 0 }
   0xd   : > { %p1037_p8 = por %p56_p5, %p55_p3  ;;  %p169_p10 = scmp.eq.s32.totalorder %s731_s25, 1 }
   0xe   : > { %p1041_p9 = por %p163_p6, %p49_p1  ;;  %p778_p13 = scmp.lt.s32.totalorder %s949_s23, 2 }
   0xf   : > { %s1046_s7 = scalar_select %p40_p7, %s937_s20, %s42_s27  }
  0x10   : > { %s1221_s6 = scalar_select %p1041_p9, 1, 0 }
  0x11   : > { %p1048_p11 = por %p169_p10, %p55_p3  ;;  %s201_s9 = sand.u32 1, %s937_s20  }
  0x12   : > { %s734_s10 = sshll.u32 %s201_s9, 4  ;;  %s745_s11 = sshll.u32 %s945_s22, 8 }
  0x13   : > { %s1222_s8 = scalar_select %p1048_p11, 1, 0 }
  0x14   : > { %s1059_s14 = scalar_lea.hbm %s1212_s0, %s745_s11  ;;  %s205_s15 = scalar_lea.vmem [#allocation3], %s734_s10 }
  0x15   : > { %s213_s16 = sshll.u32 %s205_s15, 4  ;;  %p1065_p0 = pnand %p778_p13, %p1031_p4  ;;  %s1061_s16 = int_to_ptr.vmem [resolvable:$true] %s213_s16 }
  0x16   : > { %s1070_s24 = scalar_lea.sflag [#allocation4], %s201_s9  ;;  %s837_s25 = scalar_lea.hbm %s1059_s14, 256 }
  0x17   : > { %p838_p2 = scmp.ne.s32.totalorder %s1059_s14, %s837_s25  ;;  %p839_p3 = pneg %p1065_p0 }
  0x18   : > { %s842_s28 = scalar_lea.hbm %s1212_s0, 512  ;;  %p843_p4 = scmp.lt.u32.totalorder %s1059_s14, %s1212_s0 }
  0x19   : > { %p840_p5 = pnand %p839_p3, %p838_p2  ;;  %p844_p7 = scmp.lt.u32.totalorder %s842_s28, %s837_s25 }
  0x1a   : > { %p846_p13 = scmp.lt.u32.totalorder %s837_s25, %s1059_s14 }
  0x1b   : > { %p841_p6 = pneg %p840_p5  ;;  %p845_p10 = por %p844_p7, %p843_p4 }
  0x1d   : > { %p847_p12 = por %p846_p13, %p845_p10 }
  0x1f   : > { %p848_p1 = pnand %p847_p12, %p841_p6 }
  0x21   : > { %851 = shalt.err (!%p848_p1)
}
  0x22   : > { %s852_s9 = scalar_lea.vmem %s1061_s16, 256  ;;  %s951_s12 = smov [#allocation3]  }
  0x23   : > { %p853_p2 = scmp.ne.s32.totalorder %s1061_s16, %s852_s9  ;;  %s857_s13 = sshll.u32 %s951_s12, 4  ;;  %s858_s13 = int_to_ptr.vmem [resolvable:$false] %s857_s13 }
  0x24   : > { %s859_s15 = scalar_lea.vmem %s858_s13, 512  ;;  %p860_p9 = scmp.lt.s32.totalorder %s1061_s16, %s858_s13 }
  0x25   : > { %p855_p5 = pnand %p853_p2, %p839_p3  ;;  %p861_p4 = scmp.lt.s32.totalorder %s859_s15, %s852_s9 }
  0x27   : > { %p856_p11 = pneg %p855_p5  ;;  %p862_p7 = por %p861_p4, %p860_p9 }
  0x29   : > { %p863_p10 = pnand %p862_p7, %p856_p11 }
  0x2b   : > { %866 = shalt.err (!%p863_p10)
}
  0x2c   : > { %s952_s25 = smov 128   ;;  %s953_s27 = smov 8  }
  0x2d   : > { %773 = dma.hbm_to_vmem [thread:$0]  (!%p1065_p0), %s1059_s14, 256, %s1061_s16, %s1070_s24, %s952_s25, %s952_s25, %s953_s27  }
  0x2e   : > { %p221_p12 = scmp.lt.s32.totalorder %s949_s23, 3  ;;  %p1224_p1 = scmp.ge.s32.totalorder %s949_s23, 1 }
  0x30   : > { %p222_p3 = pnand %p1224_p1, %p221_p12 }
  0x31   : > { %s1102_s29 = sand.u32 (!%p222_p3), 1, %s933_s19  }
  0x32   : > { %225 = sbr.rel (%p222_p3) target bundleno = 813 (0x32d), region = 40  ;;  %s738_s28 = sshll.u32 (!%p222_p3), %s1102_s29, 4 }
  0x33   : > { %s228_s10 = scalar_lea.sflag (!%p222_p3), [#allocation4], %s1102_s29  ;;  %s231_s11 = scalar_lea.vmem (!%p222_p3), [#allocation3], %s738_s28 }
  0x39   : > { %920 = dma.done.wait (%p1037_p8), %s228_s10, 256  }
  0x3a   : > { %922 = vsyncadd (%p1037_p8), %s228_s10, 4294967040  ;;  %vm266_vm0 = vcmask 523264   ;;  %v263_v0 = vld [vmem:[%s231_s11] sm:$0xff]  ;;  %v264_v1 = vld [vmem:[%s231_s11 + $0x8] sm:$0xff]  ;;  %v954_v4 = vmov 0   ;;  %v275_v5 = vlaneseq  ;;  %vm261_vm1 = vcmask 122880  }
  0x3b   : > { %v267_v2 = vsel %vm266_vm0, %v263_v0, 0.0  ;;  %v270_v3 = vsel %vm266_vm0, %v264_v1, 0.0  ;;  %835 = vset.pattern.permute.xlu1 %v954_v4  ;;  %836 = vset.pattern.permute.xlu0 %v954_v4  ;;  %v955_v6 = vmov 1966171168   ;;  %v956_v63 = vmov 0.0   ;;  %v479_v0 = vld [vmem:[%s1213_s1] sm:$0xff] }
  0x3c   : > { %268 = vadd.xlane.f32.xlu0 %v267_v2  ;;  %v344_v7 = vunpack.c.l.s4 %v955_v6  ;;  %v1111_v8 = vshrl.u32 %v275_v5, 7  ;;  %262 = vst.msk [vmem:[#allocation2] sm:$0x1] %vm261_vm1, %v956_v63  ;;  %758 = vmatprep.subr.mxu1 %v956_v63  ;;  %v480_v1 = vld [vmem:[%s1213_s1 + $0x8] sm:$0xff]  ;;  %v957_v2 = vmov 0.0|0.0   ;;  %vm958_vm2 = vmmov 0  }
  0x3d   : > { %763 = vmatprep.subr.bf16.mxu0 %v957_v2  ;;  %755 = vmatprep.mubr.msk.f32.mxu0 %vm958_vm2, %v956_v63  ;;  %v444_v4 = vand.u32 127, %v275_v5  ;;  %vm454_vm3 = vcmask 130112   ;;  %vm482_vm4 = vcmask 130048   ;;  %vm565_vm5 = vcmask 1043456   ;;  %s742_s27 = sshll.u32 %s941_s21, 4  ;;  %s256_s28 = scalar_lea.vmem [#allocation6], %s1102_s29 }
  0x3e   : > { %v345_v9 = vunpack.c.0.s8 %v344_v7  ;;  %v277_v10 = vsub.s32 0, %v1111_v8  ;;  %v281_v11 = vsub.s32 1, %v1111_v8  ;;  %v285_v12 = vsub.s32 2, %v1111_v8  ;;  %760 = vmatprep.mubr.msk.f32.mxu1 %vm958_vm2, %v956_v63  ;;  %s654_s10 = sshll.u32 %s256_s28, 4  ;;  %s1163_s14 = scalar_lea.hbm %s1217_s5, %s742_s27  ;;  %s1165_s10 = int_to_ptr.vmem [resolvable:$true] %s654_s10 }
  0x3f   : > { %v289_v13 = vsub.s32 3, %v1111_v8  ;;  %v293_v14 = vsub.s32 4, %v1111_v8  ;;  %v297_v15 = vsub.s32 5, %v1111_v8  ;;  %v301_v16 = vsub.s32 6, %v1111_v8  ;;  %s642_s16 = scalar_lea.sflag [#allocation5], %s1102_s29  ;;  %s867_s17 = scalar_lea.vmem %s1165_s10, 16 }
  0x40   : > { %271 = vadd.xlane.f32.xlu0 %v270_v3  ;;  %v305_v17 = vsub.s32 7, %v1111_v8  ;;  %v1122_v19 = vsub.s32 %v345_v9, %v1111_v8  ;;  %v764_v3 = vpack.c.bf16 %v480_v1, %v479_v0  ;;  %v449_v6 = vadd.s32 4294967288, %v444_v4  ;;  %p868_p8 = scmp.ne.s32.totalorder %s1165_s10, %s867_s17  ;;  %p1225_p9 = scmp.ne.s32.totalorder %s1221_s6, 0 }
  0x41   : > { %v447_v9 = vsub.s32 %v444_v4, %v1111_v8  ;;  %vm561_vm7 = vcmask 31744   ;;  %vm639_vm8 = vcmask 8192   ;;  %s959_s21 = smov [#allocation6]  }
  0x42   : > { %765 = vmatpush3.bf16.msra.mxu0 %v764_v3  ;;  %p869_p11 = pnand %p868_p8, %p1225_p9  ;;  %s871_s24 = sshll.u32 %s959_s21, 4  ;;  %s872_s24 = int_to_ptr.vmem [resolvable:$false] %s871_s24 }
  0x43   : > { %s873_s9 = scalar_lea.vmem %s872_s24, 32  ;;  %p874_p6 = scmp.lt.s32.totalorder %s1165_s10, %s872_s24 }
  0x44   : > { %p870_p0 = pneg %p869_p11  ;;  %p875_p13 = scmp.lt.s32.totalorder %s873_s9, %s867_s17 }
  0x46   : > { %p876_p2 = por %p875_p13, %p874_p6 }
  0x48   : > { %p877_p5 = pnand %p876_p2, %p870_p0 }
  0xc9   : > { %v269_v18 = vpop.xlane.xlu0 %268 }
  0xca   : > { %v278_v20 = vrot.slane %v269_v18, %v277_v10  ;;  %v282_v21 = vrot.slane %v269_v18, %v281_v11  ;;  %v286_v22 = vrot.slane %v269_v18, %v285_v12  ;;  %v290_v23 = vrot.slane %v269_v18, %v289_v13 }
  0xcb   : > { %v294_v24 = vrot.slane %v269_v18, %v293_v14  ;;  %v298_v25 = vrot.slane %v269_v18, %v297_v15  ;;  %v302_v26 = vrot.slane %v269_v18, %v301_v16  ;;  %v306_v27 = vrot.slane %v269_v18, %v305_v17 }
  0xcc   : > { %v339_v28 = vcombine.low %v278_v20, %v282_v21  ;;  %v340_v29 = vcombine.low %v286_v22, %v290_v23  ;;  %v481_v21 = vld [vmem:[%s1214_s2] sm:$0x1] }
  0xcd   : > { %v272_v30 = vpop.xlane.xlu0 %271  ;;  %v341_v31 = vcombine.low %v294_v24, %v298_v25  ;;  %v342_v32 = vcombine.low %v302_v26, %v306_v27  ;;  %v560_v26 = vld [vmem:[%s1216_s4] sm:$0x1] }
  0xce   : > { %v349_v33 = vrot.slane %v339_v28, %v1122_v19  ;;  %v356_v34 = vrot.slane %v340_v29, %v1122_v19  ;;  %v310_v35 = vrot.slane %v272_v30, %v277_v10  ;;  %v314_v36 = vrot.slane %v272_v30, %v281_v11 }
  0xcf   : > { %v363_v37 = vrot.slane %v341_v31, %v1122_v19  ;;  %v370_v38 = vrot.slane %v342_v32, %v1122_v19  ;;  %v318_v39 = vrot.slane %v272_v30, %v285_v12  ;;  %v322_v40 = vrot.slane %v272_v30, %v289_v13 }
  0xd0   : > { %v371_v41 = vcombine.low %v349_v33, %v356_v34  ;;  %v326_v42 = vrot.slane %v272_v30, %v293_v14  ;;  %v330_v43 = vrot.slane %v272_v30, %v297_v15  ;;  %v334_v44 = vrot.slane %v272_v30, %v301_v16  ;;  %v265_v16 = vld [vmem:[#allocation2] sm:$0x1] }
  0xd1   : > { %v372_v45 = vcombine.low %v363_v37, %v370_v38  ;;  %v338_v46 = vrot.slane %v272_v30, %v305_v17  ;;  %v388_v47 = vcombine.low %v310_v35, %v314_v36  ;;  %v389_v48 = vcombine.low %v318_v39, %v322_v40 }
  0xd2   : > { %v379_v49 = vrot.slane %v371_v41, %v1122_v19  ;;  %v390_v50 = vcombine.low %v326_v42, %v330_v43  ;;  %v452_v10 = vsub.s32 %v449_v6, %v1111_v8  ;;  %v559_v8 = vld [vmem:[%s1215_s3] sm:$0xf] }
  0xd3   : > { %v386_v51 = vrot.slane %v372_v45, %v1122_v19  ;;  %v391_v52 = vcombine.low %v334_v44, %v338_v46  ;;  %v398_v53 = vrot.slane %v388_v47, %v1122_v19  ;;  %v405_v54 = vrot.slane %v389_v48, %v1122_v19  ;;  %759 = vmatpush3.msk.msra.mxu1 %vm565_vm5, %v559_v8 }
  0xd4   : > { %v412_v55 = vrot.slane %v390_v50, %v1122_v19 }
  0xd5   : > { %v387_v56 = vcombine.low %v379_v49, %v386_v51  ;;  %v419_v57 = vrot.slane %v391_v52, %v1122_v19  ;;  %v420_v58 = vcombine.low %v398_v53, %v405_v54 }
  0xd7   : > { %438 = vperm.xlu1 %835, %v387_v56   ;;  %v421_v59 = vcombine.low %v412_v55, %v419_v57  ;;  %v428_v60 = vrot.slane %v420_v58, %v1122_v19 }
  0xd9   : > { %v435_v61 = vrot.slane %v421_v59, %v1122_v19 }
  0xdb   : > { %v436_v62 = vcombine.low %v428_v60, %v435_v61 }
  0xdd   : > { %441 = vperm.xlu1 %835, %v436_v62  }
 0x156   : > { %v439_v7 = vpop.permute.xlu1 %438 }
 0x157   : > { %v448_v12 = vrot.slane %v439_v7, %v447_v9 }
 0x15c   : > { %v442_v11 = vpop.permute.xlu1 %441 }
 0x15d   : > { %v453_v13 = vrot.slane %v442_v11, %v452_v10 }
 0x15f   : > { %v455_v14 = vsel %vm454_vm3, %v453_v13, %v448_v12 }
 0x160   : > { %v462_v15 = vrot.slane %v455_v14, %v1122_v19 }
 0x162   : > { %v469_v17 = vrot.slane %v462_v15, %v1122_v19 }
 0x164   : > { %v471_v18 = vadd.f32 %v469_v17, %v265_v16 }
 0x166   : > { %473 = vst.msk [vmem:[#allocation2] sm:$0x1] %vm261_vm1, %v471_v18 }
 0x16d   : > { %v477_v5 = vld [vmem:[#allocation2] sm:$0x1] }
 0x16e   : > { %v478_v20 = vmul.f32 0.015625, %v477_v5 }
 0x170   : > { %756 = vmatmul.mubr.msk.f32.vlgmr.msra.gmra.mrb[0].mxu0 %vm482_vm4, %v478_v20 }
 0x243   : > { %v552_v19 = vpop.f32.mrb[0].mxu0 }
 0x244   : > { %v553_v22 = vadd.f32 %v552_v19, %v481_v21  ;;  %v757_v23 = vpop.f32.mrb[1].mxu0 }
 0x246   : > { %vm556_vm6 = vcmp.ge.f32.partialorder %v553_v22, 0.0  ;;  %v557_v24 = vmul.f32 0.01, %v553_v22 }
 0x248   : > { %v558_v25 = vsel %vm556_vm6, %v553_v22, %v557_v24 }
 0x249   : > { %761 = vmatmul.mubr.msk.f32.vlgmr.msra.gmra.mrb[0].mxu1 %vm561_vm7, %v558_v25 }
 0x31c   : > { %v635_v27 = vpop.f32.mrb[0].mxu1 }
 0x31d   : > { %v636_v28 = vadd.f32 %v635_v27, %v560_v26  ;;  %v762_v29 = vpop.f32.mrb[1].mxu1 }
 0x31f   : > { %640 = vst.msk [vmem:[%s256_s28] sm:$0x1] %vm639_vm8, %v636_v28 }
 0x320   : > { %880 = shalt.err (!%p877_p5)
}
 0x321   : > { %s881_s29 = scalar_lea.hbm %s1163_s14, 16  ;;  %s885_s15 = scalar_lea.hbm %s1217_s5, 32 }
 0x322   : > { %p882_p4 = scmp.ne.s32.totalorder %s1163_s14, %s881_s29  ;;  %p886_p12 = scmp.lt.u32.totalorder %s1163_s14, %s1217_s5 }
 0x323   : > { %p887_p1 = scmp.lt.u32.totalorder %s885_s15, %s881_s29  ;;  %p889_p8 = scmp.lt.u32.totalorder %s881_s29, %s1163_s14 }
 0x324   : > { %p883_p7 = pnand %p882_p4, %p1225_p9 }
 0x325   : > { %p888_p3 = por %p887_p1, %p886_p12 }
 0x326   : > { %p884_p10 = pneg %p883_p7 }
 0x327   : > { %p890_p11 = por %p889_p8, %p888_p3 }
 0x329   : > { %p891_p0 = pnand %p890_p11, %p884_p10 }
 0x32b   : > { %894 = shalt.err (!%p891_p0)
}
 0x32c   : > { %768 = dma.vmem_to_hbm [thread:$0]  (%p1225_p9), %s1165_s10, 16, %s1163_s14, %s642_s16  }
 0x32d PF: > { %s666_s28 = sand.u32 1, %s929_s18   ;;  %p1226_p6 = scmp.ne.s32.totalorder %s1222_s8, 0 }
 0x32e   : > { %p1227_p13 = scmp.ge.s32.totalorder %s949_s23, 2  ;;  %s667_s11 = scalar_lea.sflag [#allocation5], %s666_s28 }
 0x330   : > { %p775_p2 = pnand %p1227_p13, %p1226_p6 }
 0x332   : > { %924 = dma.done.wait (!%p775_p2), %s667_s11, 16  }
 0x333   : > { %926 = vsyncadd (!%p775_p2), %s667_s11, 4294967280  ;;  %s21_s23 = sadd.s32 1, %s949_s23   ;;  %s1228_s18 = smov %s933_s19 }
 0x334   : > { %p18_p5 = scmp.ge.s32.totalorder %s21_s23, 4   ;;  %s1229_s19 = smov %s937_s20 }
 0x335   : > { %s1230_s20 = smov %s1046_s7  ;;  %s1231_s21 = smov %s945_s22 }
 0x336   : > { %s1232_s22 = smov %s1234_s26  ;;  %20 = sbr.rel (!%p18_p5) target bundleno = 6 (0x6), region = 93 }
 0x33d   :  { %671 = vsyncpa [#allocation4], 1 }
 0x33e   :  { %673 = vsyncpa [#allocation4 + $0x1], 1 }
 0x33f   :  { %674 = vsyncpa [#allocation5], 1 }
 0x340   :  { %676 = vsyncpa [#allocation5 + $0x1], 1 }

</bundles_post_ra>
